<compile_context>
chip_gen: v5e
topology: v5e:2x2
jax: 0.10.0
libtpu: 0.0.40
codegen_flags: <defaults>
</compile_context>

<pallas_src>
import jax
import jax.numpy as jnp
from jax.experimental import pallas as pl
from jax.experimental.pallas import tpu as pltpu

SPIKE_THRESHOLD = 1.0


def _round_up(n, m):
    return ((n + m - 1) // m) * m


def spiking_kernel(x_ref, w_ref, thr_ref, out_ref, acc_ref):
    # x_ref : (tm, tk)   w_ref : (tk, tn)   thr_ref : (1, tn)
    # out_ref : (tm, tn) acc_ref : (tm, tn) f32 scratch (persists across K steps)
    k = pl.program_id(2)

    @pl.when(k == 0)
    def _():
        acc_ref[...] = jnp.zeros_like(acc_ref)

    acc_ref[...] += jnp.dot(x_ref[...], w_ref[...],
                            preferred_element_type=jnp.float32)

    @pl.when(k == pl.num_programs(2) - 1)
    def _():
        # bias is folded into thr:  (x @ W^T + b) >= 1.0  <=>  x @ W^T >= (1.0 - b)
        out_ref[...] = (acc_ref[...] >= thr_ref[...]).astype(out_ref.dtype)


@jax.jit
def spiking_forward(x, w_t, bias):
    """x: (B, In) f32; w_t: (In, H) f32 (pre-transposed nn.Linear weight); bias: (H,) f32."""
    B, In = x.shape
    H = w_t.shape[1]

    # Tile sizes: tm multiple of 8 (f32 sublane), tn / tk multiples of 128 (lanes).
    tm = min(256, _round_up(B, 8))
    tn = min(512, _round_up(H, 128))
    tk = min(512, _round_up(In, 128))
    Bp, Hp, Inp = _round_up(B, tm), _round_up(H, tn), _round_up(In, tk)

    # Zero-pad to tile multiples (zeros in K don't change the matmul; padded M/N rows
    # and cols are sliced off below).
    xp = jnp.pad(x, ((0, Bp - B), (0, Inp - In)))
    wp = jnp.pad(w_t, ((0, Inp - In), (0, Hp - H)))
    thr = (SPIKE_THRESHOLD - bias).reshape(1, H)
    thrp = jnp.pad(thr, ((0, 0), (0, Hp - H)),
                   constant_values=SPIKE_THRESHOLD)

    grid = (Bp // tm, Hp // tn, Inp // tk)

    out = pl.pallas_call(
        spiking_kernel,
        out_shape=jax.ShapeDtypeStruct((Bp, Hp), jnp.float32),
        grid_spec=pltpu.PrefetchScalarGridSpec(
            num_scalar_prefetch=0,
            grid=grid,
            in_specs=[
                pl.BlockSpec((tm, tk), lambda i, j, k: (i, k)),   # x tile
                pl.BlockSpec((tk, tn), lambda i, j, k: (k, j)),   # W^T tile
                pl.BlockSpec((1, tn), lambda i, j, k: (0, j)),    # threshold row
            ],
            out_specs=pl.BlockSpec((tm, tn), lambda i, j, k: (i, j)),
            scratch_shapes=[pltpu.VMEM((tm, tn), jnp.float32)],
        ),
        compiler_params=pltpu.CompilerParams(
            dimension_semantics=("parallel", "parallel", "arbitrary"),
            vmem_limit_bytes=48 * 1024 * 1024,
        ),
        cost_estimate=pl.CostEstimate(
            flops=2 * Bp * Inp * Hp,
            bytes_accessed=4 * (Bp * Inp + Inp * Hp + Bp * Hp),
            transcendentals=0,
        ),
    )(xp, wp, thrp)

    return out[:B, :H]


def init_linear_params(key, input_size, hidden_size):
    """Mirror nn.Linear default init U(-1/sqrt(in), 1/sqrt(in)).

    The weight is stored already transposed as (input_size, hidden_size) so the
    kernel consumes it directly with no per-call transpose / extra HBM pass.
    """
    kw, kb = jax.random.split(key)
    bound = 1.0 / jnp.sqrt(jnp.float32(input_size))
    w_t = jax.random.uniform(kw, (input_size, hidden_size),
                             minval=-bound, maxval=bound, dtype=jnp.float32)
    bias = jax.random.uniform(kb, (hidden_size,),
                              minval=-bound, maxval=bound, dtype=jnp.float32)
    return w_t, bias


if __name__ == "__main__":
    key = jax.random.PRNGKey(0)
    k_x, k_p = jax.random.split(key)

    batch, input_size, hidden_size = 8, 32, 32
    x = jax.random.normal(k_x, (batch, input_size), dtype=jnp.float32)
    w_t, bias = init_linear_params(k_p, input_size, hidden_size)

    out = spiking_forward(x, w_t, bias)
    out = jax.block_until_ready(out)
    assert out.shape == (batch, hidden_size)

    # Reference in plain JAX (same semantics as the PyTorch forward).
    membrane_ref = x @ w_t + bias
    spikes_ref = (membrane_ref >= SPIKE_THRESHOLD).astype(jnp.float32)

    # Thresholded binary outputs can flip for membrane values sitting exactly on the
    # threshold when reduction order differs; only compare spikes away from the edge.
    safe = jnp.abs(membrane_ref - SPIKE_THRESHOLD) > 1e-4
    assert bool(jnp.all(jnp.where(safe, out == spikes_ref, True)))
    # Output must be exactly binary.
    assert bool(jnp.all((out == 0.0) | (out == 1.0)))

    print("KERNEL_OK")
</pallas_src>

<mosaic_0001>
module attributes {stable_mosaic.version = 11 : i64} {
  func.func @spiking_kernel(%arg0: i32, %arg1: i32, %arg2: i32, %arg3: memref<8x128xf32, #tpu.memory_space<vmem>>, %arg4: memref<128x128xf32, #tpu.memory_space<vmem>>, %arg5: memref<1x128xf32, #tpu.memory_space<vmem>>, %arg6: memref<8x128xf32, #tpu.memory_space<vmem>>, %arg7: memref<8x128xf32, #tpu.memory_space<vmem>>) attributes {dimension_semantics = [#tpu.dimension_semantics<parallel>, #tpu.dimension_semantics<parallel>, #tpu.dimension_semantics<arbitrary>], iteration_bounds = array<i64: 1, 1, 1>, scalar_prefetch = 0 : i64, scratch_operands = 1 : i64, tpu.core_type = #tpu.core_type<tc>, window_params = [{transform_indices = @transform_0, window_bounds = array<i64: 8, 128>}, {transform_indices = @transform_1, window_bounds = array<i64: 128, 128>}, {transform_indices = @transform_2, window_bounds = array<i64: 1, 128>}, {transform_indices = @transform_3, window_bounds = array<i64: 8, 128>}]} {
    %c0_i32 = arith.constant 0 : i32
    %0 = arith.cmpi eq, %arg2, %c0_i32 : i32
    %1 = arith.extui %0 : i1 to i32
    %c0_i32_0 = arith.constant 0 : i32
    %2 = arith.cmpi ne, %1, %c0_i32_0 : i32
    scf.if %2 {
      %cst_10 = arith.constant 0.000000e+00 : f32
      %12 = vector.broadcast %cst_10 : f32 to vector<8x128xf32>
      %c0_11 = arith.constant 0 : index
      %c0_12 = arith.constant 0 : index
      %13 = vector.load %arg7[%c0_11, %c0_12] : memref<8x128xf32, #tpu.memory_space<vmem>>, vector<8x128xf32>
      tpu.vector_store %arg7[%c0_11, %c0_12], %12 {strides = array<i32>} : memref<8x128xf32, #tpu.memory_space<vmem>>, vector<8x128xf32>,
    } else {
    }
    %c0 = arith.constant 0 : index
    %c0_1 = arith.constant 0 : index
    %3 = vector.load %arg7[%c0, %c0_1] : memref<8x128xf32, #tpu.memory_space<vmem>>, vector<8x128xf32>
    %c0_2 = arith.constant 0 : index
    %c0_3 = arith.constant 0 : index
    %4 = vector.load %arg3[%c0_2, %c0_3] : memref<8x128xf32, #tpu.memory_space<vmem>>, vector<8x128xf32>
    %c0_4 = arith.constant 0 : index
    %c0_5 = arith.constant 0 : index
    %5 = vector.load %arg4[%c0_4, %c0_5] : memref<128x128xf32, #tpu.memory_space<vmem>>, vector<128x128xf32>
    %cst = arith.constant dense<0.000000e+00> : vector<8x128xf32>
    %6 = tpu.matmul %4, %5, %cst {dimension_numbers = #tpu.dot_dimension_numbers<[1], [0], [0], [1], [0, 0, 1, 1], [], []>} : vector<8x128xf32>, vector<128x128xf32>, vector<8x128xf32> -> vector<8x128xf32>
    %7 = arith.addf %3, %6 : vector<8x128xf32>
    %c0_6 = arith.constant 0 : index
    %c0_7 = arith.constant 0 : index
    %8 = vector.load %arg7[%c0_6, %c0_7] : memref<8x128xf32, #tpu.memory_space<vmem>>, vector<8x128xf32>
    tpu.vector_store %arg7[%c0_6, %c0_7], %7 {strides = array<i32>} : memref<8x128xf32, #tpu.memory_space<vmem>>, vector<8x128xf32>,
    %c0_i32_8 = arith.constant 0 : i32
    %9 = arith.cmpi eq, %arg2, %c0_i32_8 : i32
    %10 = arith.extui %9 : i1 to i32
    %c0_i32_9 = arith.constant 0 : i32
    %11 = arith.cmpi ne, %10, %c0_i32_9 : i32
    scf.if %11 {
      %c0_10 = arith.constant 0 : index
      %c0_11 = arith.constant 0 : index
      %12 = vector.load %arg7[%c0_10, %c0_11] : memref<8x128xf32, #tpu.memory_space<vmem>>, vector<8x128xf32>
      %c0_12 = arith.constant 0 : index
      %c0_13 = arith.constant 0 : index
      %13 = vector.load %arg5[%c0_12, %c0_13] : memref<1x128xf32, #tpu.memory_space<vmem>>, vector<1x128xf32>
      %14 = vector.broadcast %13 : vector<1x128xf32> to vector<8x128xf32>
      %15 = arith.cmpf oge, %12, %14 : vector<8x128xf32>
      %16 = arith.extui %15 : vector<8x128xi1> to vector<8x128xi32>
      %17 = arith.sitofp %16 : vector<8x128xi32> to vector<8x128xf32>
      %c0_14 = arith.constant 0 : index
      %c0_15 = arith.constant 0 : index
      %18 = vector.load %arg6[%c0_14, %c0_15] : memref<8x128xf32, #tpu.memory_space<vmem>>, vector<8x128xf32>
      tpu.vector_store %arg6[%c0_14, %c0_15], %17 {strides = array<i32>} : memref<8x128xf32, #tpu.memory_space<vmem>>, vector<8x128xf32>,
    } else {
    }
    return
  }
  func.func @transform_0(%arg0: i32, %arg1: i32, %arg2: i32) -> (i32, i32) {
    %c0_i32 = arith.constant 0 : i32
    return %arg0, %arg2 : i32, i32
  }
  func.func @transform_1(%arg0: i32, %arg1: i32, %arg2: i32) -> (i32, i32) {
    %c0_i32 = arith.constant 0 : i32
    return %arg2, %arg1 : i32, i32
  }
  func.func @transform_2(%arg0: i32, %arg1: i32, %arg2: i32) -> (i32, i32) {
    %c0_i32 = arith.constant 0 : i32
    %c0_i32_0 = arith.constant 0 : i32
    return %c0_i32, %arg1 : i32, i32
  }
  func.func @transform_3(%arg0: i32, %arg1: i32, %arg2: i32) -> (i32, i32) {
    %c0_i32 = arith.constant 0 : i32
    return %arg0, %arg1 : i32, i32
  }
}

</mosaic_0001>

<bundles_post_ra>
// kernel: spiking_forward.1
= control target key start
LH: loop header
LB: loop body
LE: loop exit
PB: predicated region body
PF: predicated region fallthrough
CT: control target
= control target key end

     0   :  { %s197_s0 = inlined_call_operand.vmem [shape: f32[8,128], index: 0, kind: input, shape index: {}]   ;;  %s198_s1 = inlined_call_operand.vmem [shape: f32[128,128], index: 1, kind: input, shape index: {}]   ;;  %s199_s2 = inlined_call_operand.vmem [shape: f32[1,128], index: 2, kind: input, shape index: {}]   ;;  %s200_s3 = inlined_call_operand.hbm [shape: f32[8,128], index: 3, kind: output, shape index: {}]  }
   0x1   :  { %v37_v0 = vld [vmem:[%s198_s1 + $0x78] sm:$0xff]  ;;  %v36_v1 = vld [vmem:[%s198_s1 + $0x70] sm:$0xff]  ;;  %v35_v2 = vld [vmem:[%s198_s1 + $0x68] sm:$0xff] }
   0x2   :  { %38 = vmatpush.msra.mxu0 %v37_v0  ;;  %v34_v3 = vld [vmem:[%s198_s1 + $0x60] sm:$0xff]  ;;  %v33_v4 = vld [vmem:[%s198_s1 + $0x58] sm:$0xff] }
   0x4   :  { %39 = vmatpush.msra.mxu0 %v36_v1 }
   0x6   :  { %40 = vmatpush.msra.mxu0 %v35_v2 }
   0x7   :  { %8 = vsyncpa [#allocation4], 0  ;;  %v32_v5 = vld [vmem:[%s198_s1 + $0x50] sm:$0xff]  ;;  %v31_v6 = vld [vmem:[%s198_s1 + $0x48] sm:$0xff]  ;;  %s118_s21 = smov [#allocation3]   ;;  %s79_s25 = sshll.u32 %s200_s3, 4  ;;  %s80_s25 = int_to_ptr.hbm [resolvable:$true] %s79_s25 }
   0x8   :  { %41 = vmatpush.msra.mxu0 %v34_v3  ;;  %v30_v7 = vld [vmem:[%s198_s1 + $0x40] sm:$0xff]  ;;  %v29_v8 = vld [vmem:[%s198_s1 + $0x38] sm:$0xff]  ;;  %v28_v9 = vld [vmem:[%s198_s1 + $0x30] sm:$0xff]  ;;  %s77_s22 = sshll.u32 %s118_s21, 4  ;;  %v119_v19 = vmov 0.0   ;;  %s78_s22 = int_to_ptr.vmem [resolvable:$true] %s77_s22 }
   0x9   :  { %v27_v10 = vld [vmem:[%s198_s1 + $0x28] sm:$0xff]  ;;  %v26_v11 = vld [vmem:[%s198_s1 + $0x20] sm:$0xff]  ;;  %v25_v12 = vld [vmem:[%s198_s1 + $0x18] sm:$0xff] }
   0xa   :  { %42 = vmatpush.msra.mxu0 %v33_v4  ;;  %v24_v13 = vld [vmem:[%s198_s1 + $0x10] sm:$0xff]  ;;  %v23_v14 = vld [vmem:[%s198_s1 + $0x8] sm:$0xff]  ;;  %v22_v15 = vld [vmem:[%s198_s1] sm:$0xff] }
   0xb   :  { %v21_v16 = vld [vmem:[%s197_s0] sm:$0xff] }
   0xc   :  { %43 = vmatpush.msra.mxu0 %v32_v5  ;;  %v91_v17 = vld [vmem:[%s199_s2] ss:$0 sm:$0xff] }
   0xe   :  { %44 = vmatpush.msra.mxu0 %v31_v6 }
  0x10   :  { %45 = vmatpush.msra.mxu0 %v30_v7 }
  0x12   :  { %46 = vmatpush.msra.mxu0 %v29_v8 }
  0x14   :  { %47 = vmatpush.msra.mxu0 %v28_v9 }
  0x16   :  { %48 = vmatpush.msra.mxu0 %v27_v10 }
  0x18   :  { %49 = vmatpush.msra.mxu0 %v26_v11 }
  0x1a   :  { %50 = vmatpush.msra.mxu0 %v25_v12 }
  0x1c   :  { %51 = vmatpush.msra.mxu0 %v24_v13 }
  0x1e   :  { %52 = vmatpush.msra.mxu0 %v23_v14 }
  0x20   :  { %53 = vmatpush.msra.mxu0 %v22_v15 }
  0x21   :  { %54 = vmatmul.f32.vlgmr.msra.gmra.mxu0 %v21_v16 }
  0x9e   :  { %v55_v18 = vpop.f32.mrf.mxu0 }
  0x9f   :  { %vm68_vm0 = vcmp.ge.f32.partialorder %v55_v18, %v91_v17 }
  0xa0   :  { %v88_v20 = vsel %vm68_vm0, 1.0, %v119_v19 }
  0xa1   :  { %71 = vst [vmem:[#allocation3] sm:$0xff] %v88_v20 }
  0xa2   :  { %82 = dma.vmem_to_hbm [thread:$0]  %s78_s22, 128, %s80_s25, [#allocation4]  }
  0xa3   :  { %116 = dma.done.wait [#allocation4], 128  }
  0xa4   :  { %117 = vsyncadd [#allocation4], 4294967168 }
  0xa5   :  { %87 = vsyncpa [#allocation4], 1 }

</bundles_post_ra>
